<compile_context>
chip_gen: v7x
topology: tpu7x:2x2x1
jax: 0.10.0
libtpu: 0.0.40
codegen_flags: <defaults>
</compile_context>

<pallas_src>
import functools
import math

import jax
import jax.numpy as jnp
import numpy as np
from jax.experimental import pallas as pl
from jax.experimental.pallas import tpu as pltpu

# ---------------- model hyper-parameters (small, consistent with the module) ---------
SEQ = 8        # L
BATCH = 2      # N
DIM = 32       # E  (embed_dim)
NUM_HEADS = 4  # H
HEAD_DIM = DIM // NUM_HEADS
LANE_PAD = 128  # pad the embedding axis to a full 128-lane register (lane-dense I/O)


# ---------------------------------- Pallas kernel ------------------------------------
def _transformer_layer_kernel(
    x_ref,       # (N*L, Ep) f32, batch-major rows (n, l); cols >= E are zero padding
    wqkv_ref,    # (Ep, 3E)  bf16, folded q/k/v+in_proj, scale folded into Q, pre-transposed,
                 #            zero rows beyond E
    bqkv_ref,    # (1, 3E)   f32, in_proj bias (scale folded into Q part)
    wo_ref,      # (E, Ep)   bf16, out_proj.weight pre-transposed, zero cols beyond E
    bo_ref,      # (1, Ep)   f32, zero beyond E
    wfc1_ref,    # (Ep, Ep)  bf16, pre-transposed, zero outside the real (E,E) block
    wfc2_ref,    # (Ep, Ep)  bf16, pre-transposed, zero outside the real (E,E) block
    out_ref,     # (N*L, Ep) f32, lane-dense output
    *,
    num_heads: int,
    batch: int,
    seq: int,
    dim: int,
):
    H, N, L, E = num_heads, batch, seq, dim
    hd = E // H

    x = x_ref[...]                                   # (NL, Ep) f32
    xb = x.astype(jnp.bfloat16)

    # single fused QKV projection; contraction is a full 128 lanes (padded rows are zero)
    qkv = jnp.dot(xb, wqkv_ref[...],
                  preferred_element_type=jnp.float32) + bqkv_ref[...]   # (NL, 3E) f32

    q = qkv[:, 0 * E:1 * E]                          # (NL, E) — already scaled by 1/sqrt(hd)
    k = qkv[:, 1 * E:2 * E]
    v = qkv[:, 2 * E:3 * E]

    # split heads ONCE (f32, all reshapes on (8,128) tile boundaries) and pack into a single
    # (H*N, L, hd) batch so attention is one batched contraction instead of an (n,h) loop
    def to_heads(t):
        return jnp.concatenate(
            [t[:, h * hd:(h + 1) * hd].reshape(N, L, hd) for h in range(H)], axis=0)

    qs = to_heads(q).astype(jnp.bfloat16)            # (H*N, L, hd), b = h*N + n
    ks = to_heads(k).astype(jnp.bfloat16)
    vs = to_heads(v).astype(jnp.bfloat16)

    s = jnp.einsum('bld,bmd->blm', qs, ks,
                   preferred_element_type=jnp.float32)                  # (H*N, L, L) f32
    s = s - jnp.max(s, axis=-1, keepdims=True)
    p = jnp.exp(s)
    p = p * pl.reciprocal(jnp.sum(p, axis=-1, keepdims=True), approx=False)
    a = jnp.einsum('blm,bmd->bld', p.astype(jnp.bfloat16), vs,
                   preferred_element_type=jnp.float32)                  # (H*N, L, hd) f32

    # merge heads back to (N*L, E) in registers (no VMEM scratch round-trip)
    attn = jnp.concatenate(
        [a[h * N:(h + 1) * N].reshape(N * L, hd) for h in range(H)], axis=-1)  # (NL, E)

    # out-projection (bias=True) + residual; output width Ep = 128 -> lane-dense
    attn_out = jnp.dot(attn.astype(jnp.bfloat16), wo_ref[...],
                       preferred_element_type=jnp.float32) + bo_ref[...]
    x1 = attn_out + x                                                     # (NL, Ep)

    # feed-forward (both Linear bias=False, no activation in the module) + residual
    h1 = jnp.dot(x1.astype(jnp.bfloat16), wfc1_ref[...],
                 preferred_element_type=jnp.float32)
    y = jnp.dot(h1.astype(jnp.bfloat16), wfc2_ref[...],
                preferred_element_type=jnp.float32) + x1

    out_ref[...] = y.astype(out_ref.dtype)           # full-lane unmasked store


# ---------------------------------- wrapper ------------------------------------------
def transformer_layer(x, params, num_heads):
    L, N, E = x.shape
    H = num_heads
    hd = E // H
    scale = 1.0 / math.sqrt(hd)
    Ep = LANE_PAD

    # ---- host-side parameter preparation (would normally be done once at init) ----
    win, b_in = params["win"], params["bin"]
    # fold outer q/k/v Linears into the MHA in-projection; fold 1/sqrt(hd) into Q
    wq_f = scale * (win[:E] @ params["wq"])           # (E, E)
    wk_f = win[E:2 * E] @ params["wk"]
    wv_f = win[2 * E:] @ params["wv"]
    wqkv_t = jnp.concatenate([wq_f, wk_f, wv_f], axis=0).T              # (E, 3E)
    wqkv_t = (jnp.zeros((Ep, 3 * E), jnp.float32).at[:E].set(wqkv_t)
              ).astype(jnp.bfloat16)                                     # (Ep, 3E)
    bqkv = jnp.concatenate([scale * b_in[:E], b_in[E:2 * E], b_in[2 * E:]]
                           ).reshape(1, 3 * E).astype(jnp.float32)

    wo_t = (jnp.zeros((E, Ep), jnp.float32).at[:, :E].set(params["wo"].T)
            ).astype(jnp.bfloat16)                                       # (E, Ep)
    bo = jnp.zeros((1, Ep), jnp.float32).at[:, :E].set(params["bo"])
    wfc1_t = (jnp.zeros((Ep, Ep), jnp.float32).at[:E, :E].set(params["wfc1"].T)
              ).astype(jnp.bfloat16)
    wfc2_t = (jnp.zeros((Ep, Ep), jnp.float32).at[:E, :E].set(params["wfc2"].T)
              ).astype(jnp.bfloat16)

    # batch-major, lane-dense (zero-padded to 128 lanes) 2-D activation slab
    x_bm = jnp.transpose(x, (1, 0, 2)).reshape(N * L, E)
    x_bm = jnp.zeros((N * L, Ep), x.dtype).at[:, :E].set(x_bm)

    vmem = pl.BlockSpec(memory_space=pltpu.MemorySpace.VMEM)
    kernel = functools.partial(_transformer_layer_kernel,
                               num_heads=H, batch=N, seq=L, dim=E)
    out_bm = pl.pallas_call(
        kernel,
        out_shape=jax.ShapeDtypeStruct((N * L, Ep), x.dtype),
        in_specs=[vmem] * 7,
        out_specs=vmem,
    )(x_bm, wqkv_t, bqkv, wo_t, bo, wfc1_t, wfc2_t)

    return jnp.transpose(out_bm[:, :E].reshape(N, L, E), (1, 0, 2))


# ---------------------------------- reference (numpy, float64) -----------------------
def reference(x, params, num_heads):
    x = np.asarray(x, np.float64)
    p = {k: np.asarray(v, np.float64) for k, v in params.items()}
    L, N, E = x.shape
    H, hd = num_heads, E // num_heads
    xf = x.reshape(L * N, E)
    q, k, v = xf @ p["wq"].T, xf @ p["wk"].T, xf @ p["wv"].T
    qi = q @ p["win"][:E].T + p["bin"][:E]
    ki = k @ p["win"][E:2 * E].T + p["bin"][E:2 * E]
    vi = v @ p["win"][2 * E:].T + p["bin"][2 * E:]
    q3 = qi.reshape(L, N * H, hd).transpose(1, 0, 2) / math.sqrt(hd)
    k3 = ki.reshape(L, N * H, hd).transpose(1, 0, 2)
    v3 = vi.reshape(L, N * H, hd).transpose(1, 0, 2)
    s = np.einsum('bld,bmd->blm', q3, k3)
    s = s - s.max(-1, keepdims=True)
    pr = np.exp(s)
    pr = pr / pr.sum(-1, keepdims=True)
    a = np.einsum('blm,bmd->bld', pr, v3)
    af = a.transpose(1, 0, 2).reshape(L * N, E)
    x1 = af @ p["wo"].T + p["bo"] + xf
    y = (x1 @ p["wfc1"].T) @ p["wfc2"].T + x1
    return y.reshape(L, N, E)


# ---------------------------------- main ---------------------------------------------
if __name__ == "__main__":
    key = jax.random.PRNGKey(0)
    keys = jax.random.split(key, 11)

    def w(k, shape, scale=0.1):
        return scale * jax.random.normal(k, shape, dtype=jnp.float32)

    params = {
        "wq":   w(keys[0], (DIM, DIM)),
        "wk":   w(keys[1], (DIM, DIM)),
        "wv":   w(keys[2], (DIM, DIM)),
        "win":  w(keys[3], (3 * DIM, DIM)),
        "bin":  w(keys[4], (3 * DIM,)),
        "wo":   w(keys[5], (DIM, DIM)),
        "bo":   w(keys[6], (DIM,)),
        "wfc1": w(keys[7], (DIM, DIM)),
        "wfc2": w(keys[8], (DIM, DIM)),
    }
    x = jax.random.normal(keys[9], (SEQ, BATCH, DIM), dtype=jnp.float32)

    out = transformer_layer(x, params, NUM_HEADS)
    out = jax.block_until_ready(out)

    ref = reference(x, params, NUM_HEADS)
    np.testing.assert_allclose(np.asarray(out), ref, rtol=2e-2, atol=2e-2)

    print("KERNEL_OK")
</pallas_src>

<mosaic_0001>
module attributes {stable_mosaic.version = 11 : i64} {
  func.func @_transformer_layer_kernel(%arg0: memref<16x128xf32, #tpu.memory_space<vmem>>, %arg1: memref<128x96xbf16, #tpu.memory_space<vmem>>, %arg2: memref<1x96xf32, #tpu.memory_space<vmem>>, %arg3: memref<32x128xbf16, #tpu.memory_space<vmem>>, %arg4: memref<1x128xf32, #tpu.memory_space<vmem>>, %arg5: memref<128x128xbf16, #tpu.memory_space<vmem>>, %arg6: memref<128x128xbf16, #tpu.memory_space<vmem>>, %arg7: memref<16x128xf32, #tpu.memory_space<vmem>>) attributes {dimension_semantics = [], scalar_prefetch = 0 : i64, scratch_operands = 0 : i64, tpu.core_type = #tpu.core_type<tc>} {
    %c0 = arith.constant 0 : index
    %c0_0 = arith.constant 0 : index
    %0 = vector.load %arg0[%c0, %c0_0] : memref<16x128xf32, #tpu.memory_space<vmem>>, vector<16x128xf32>
    %1 = arith.truncf %0 : vector<16x128xf32> to vector<16x128xbf16>
    %c0_1 = arith.constant 0 : index
    %c0_2 = arith.constant 0 : index
    %2 = vector.load %arg1[%c0_1, %c0_2] : memref<128x96xbf16, #tpu.memory_space<vmem>>, vector<128x96xbf16>
    %cst = arith.constant dense<0.000000e+00> : vector<16x96xf32>
    %3 = tpu.matmul %1, %2, %cst {dimension_numbers = #tpu.dot_dimension_numbers<[1], [0], [0], [1], [0, 0, 1, 1], [], []>} : vector<16x128xbf16>, vector<128x96xbf16>, vector<16x96xf32> -> vector<16x96xf32>
    %c0_3 = arith.constant 0 : index
    %c0_4 = arith.constant 0 : index
    %4 = vector.load %arg2[%c0_3, %c0_4] : memref<1x96xf32, #tpu.memory_space<vmem>>, vector<1x96xf32>
    %5 = vector.broadcast %4 : vector<1x96xf32> to vector<16x96xf32>
    %6 = arith.addf %3, %5 : vector<16x96xf32>
    %7 = vector.extract_strided_slice %6 {offsets = [0, 0], sizes = [16, 32], strides = [1, 1]} : vector<16x96xf32> to vector<16x32xf32>
    %8 = vector.extract_strided_slice %6 {offsets = [0, 32], sizes = [16, 32], strides = [1, 1]} : vector<16x96xf32> to vector<16x32xf32>
    %9 = vector.extract_strided_slice %6 {offsets = [0, 64], sizes = [16, 32], strides = [1, 1]} : vector<16x96xf32> to vector<16x32xf32>
    %10 = vector.extract_strided_slice %7 {offsets = [0, 0], sizes = [16, 8], strides = [1, 1]} : vector<16x32xf32> to vector<16x8xf32>
    %11 = vector.shape_cast %10 : vector<16x8xf32> to vector<2x8x8xf32>
    %12 = vector.extract_strided_slice %7 {offsets = [0, 8], sizes = [16, 8], strides = [1, 1]} : vector<16x32xf32> to vector<16x8xf32>
    %13 = vector.shape_cast %12 : vector<16x8xf32> to vector<2x8x8xf32>
    %14 = vector.extract_strided_slice %7 {offsets = [0, 16], sizes = [16, 8], strides = [1, 1]} : vector<16x32xf32> to vector<16x8xf32>
    %15 = vector.shape_cast %14 : vector<16x8xf32> to vector<2x8x8xf32>
    %16 = vector.extract_strided_slice %7 {offsets = [0, 24], sizes = [16, 8], strides = [1, 1]} : vector<16x32xf32> to vector<16x8xf32>
    %17 = vector.shape_cast %16 : vector<16x8xf32> to vector<2x8x8xf32>
    %18 = tpu.concatenate %11, %13, %15, %17 in 0 : vector<2x8x8xf32>, vector<2x8x8xf32>, vector<2x8x8xf32>, vector<2x8x8xf32> -> vector<8x8x8xf32>
    %19 = arith.truncf %18 : vector<8x8x8xf32> to vector<8x8x8xbf16>
    %20 = vector.extract_strided_slice %8 {offsets = [0, 0], sizes = [16, 8], strides = [1, 1]} : vector<16x32xf32> to vector<16x8xf32>
    %21 = vector.shape_cast %20 : vector<16x8xf32> to vector<2x8x8xf32>
    %22 = vector.extract_strided_slice %8 {offsets = [0, 8], sizes = [16, 8], strides = [1, 1]} : vector<16x32xf32> to vector<16x8xf32>
    %23 = vector.shape_cast %22 : vector<16x8xf32> to vector<2x8x8xf32>
    %24 = vector.extract_strided_slice %8 {offsets = [0, 16], sizes = [16, 8], strides = [1, 1]} : vector<16x32xf32> to vector<16x8xf32>
    %25 = vector.shape_cast %24 : vector<16x8xf32> to vector<2x8x8xf32>
    %26 = vector.extract_strided_slice %8 {offsets = [0, 24], sizes = [16, 8], strides = [1, 1]} : vector<16x32xf32> to vector<16x8xf32>
    %27 = vector.shape_cast %26 : vector<16x8xf32> to vector<2x8x8xf32>
    %28 = tpu.concatenate %21, %23, %25, %27 in 0 : vector<2x8x8xf32>, vector<2x8x8xf32>, vector<2x8x8xf32>, vector<2x8x8xf32> -> vector<8x8x8xf32>
    %29 = arith.truncf %28 : vector<8x8x8xf32> to vector<8x8x8xbf16>
    %30 = vector.extract_strided_slice %9 {offsets = [0, 0], sizes = [16, 8], strides = [1, 1]} : vector<16x32xf32> to vector<16x8xf32>
    %31 = vector.shape_cast %30 : vector<16x8xf32> to vector<2x8x8xf32>
    %32 = vector.extract_strided_slice %9 {offsets = [0, 8], sizes = [16, 8], strides = [1, 1]} : vector<16x32xf32> to vector<16x8xf32>
    %33 = vector.shape_cast %32 : vector<16x8xf32> to vector<2x8x8xf32>
    %34 = vector.extract_strided_slice %9 {offsets = [0, 16], sizes = [16, 8], strides = [1, 1]} : vector<16x32xf32> to vector<16x8xf32>
    %35 = vector.shape_cast %34 : vector<16x8xf32> to vector<2x8x8xf32>
    %36 = vector.extract_strided_slice %9 {offsets = [0, 24], sizes = [16, 8], strides = [1, 1]} : vector<16x32xf32> to vector<16x8xf32>
    %37 = vector.shape_cast %36 : vector<16x8xf32> to vector<2x8x8xf32>
    %38 = tpu.concatenate %31, %33, %35, %37 in 0 : vector<2x8x8xf32>, vector<2x8x8xf32>, vector<2x8x8xf32>, vector<2x8x8xf32> -> vector<8x8x8xf32>
    %39 = arith.truncf %38 : vector<8x8x8xf32> to vector<8x8x8xbf16>
    "tpu.trace_start"() <{level = 10 : i32, message = "bld,bmd->blm"}> : () -> ()
    %cst_5 = arith.constant dense<0.000000e+00> : vector<8x8x8xf32>
    %40 = tpu.matmul %19, %29, %cst_5 {dimension_numbers = #tpu.dot_dimension_numbers<[2], [2], [1], [1], [0, 0, 0, 1, 1, 1], [0], [0]>} : vector<8x8x8xbf16>, vector<8x8x8xbf16>, vector<8x8x8xf32> -> vector<8x8x8xf32>
    "tpu.trace_stop"() : () -> ()
    %cst_6 = arith.constant dense<0xFF800000> : vector<8x8xf32>
    %41 = vector.multi_reduction <maximumf>, %40, %cst_6 [2] : vector<8x8x8xf32> to vector<8x8xf32>
    %42 = vector.shape_cast %41 : vector<8x8xf32> to vector<8x8x1xf32>
    %43 = vector.broadcast %42 : vector<8x8x1xf32> to vector<8x8x8xf32>
    %44 = arith.subf %40, %43 : vector<8x8x8xf32>
    %45 = math.exp %44 : vector<8x8x8xf32>
    %cst_7 = arith.constant dense<0.000000e+00> : vector<8x8xf32>
    %46 = vector.multi_reduction <add>, %45, %cst_7 [2] : vector<8x8x8xf32> to vector<8x8xf32>
    %47 = vector.shape_cast %46 : vector<8x8xf32> to vector<8x8x1xf32>
    %48 = tpu.reciprocal %47 : vector<8x8x1xf32> -> vector<8x8x1xf32>
    %49 = vector.broadcast %48 : vector<8x8x1xf32> to vector<8x8x8xf32>
    %50 = arith.mulf %45, %49 : vector<8x8x8xf32>
    %51 = arith.truncf %50 : vector<8x8x8xf32> to vector<8x8x8xbf16>
    "tpu.trace_start"() <{level = 10 : i32, message = "blm,bmd->bld"}> : () -> ()
    %cst_8 = arith.constant dense<0.000000e+00> : vector<8x8x8xf32>
    %52 = tpu.matmul %51, %39, %cst_8 {dimension_numbers = #tpu.dot_dimension_numbers<[2], [1], [1], [2], [0, 0, 0, 1, 1, 2], [0], [0]>} : vector<8x8x8xbf16>, vector<8x8x8xbf16>, vector<8x8x8xf32> -> vector<8x8x8xf32>
    "tpu.trace_stop"() : () -> ()
    %53 = vector.extract_strided_slice %52 {offsets = [0, 0, 0], sizes = [2, 8, 8], strides = [1, 1, 1]} : vector<8x8x8xf32> to vector<2x8x8xf32>
    %54 = vector.shape_cast %53 : vector<2x8x8xf32> to vector<16x8xf32>
    %55 = vector.extract_strided_slice %52 {offsets = [2, 0, 0], sizes = [2, 8, 8], strides = [1, 1, 1]} : vector<8x8x8xf32> to vector<2x8x8xf32>
    %56 = vector.shape_cast %55 : vector<2x8x8xf32> to vector<16x8xf32>
    %57 = vector.extract_strided_slice %52 {offsets = [4, 0, 0], sizes = [2, 8, 8], strides = [1, 1, 1]} : vector<8x8x8xf32> to vector<2x8x8xf32>
    %58 = vector.shape_cast %57 : vector<2x8x8xf32> to vector<16x8xf32>
    %59 = vector.extract_strided_slice %52 {offsets = [6, 0, 0], sizes = [2, 8, 8], strides = [1, 1, 1]} : vector<8x8x8xf32> to vector<2x8x8xf32>
    %60 = vector.shape_cast %59 : vector<2x8x8xf32> to vector<16x8xf32>
    %61 = tpu.concatenate %54, %56, %58, %60 in 1 : vector<16x8xf32>, vector<16x8xf32>, vector<16x8xf32>, vector<16x8xf32> -> vector<16x32xf32>
    %62 = arith.truncf %61 : vector<16x32xf32> to vector<16x32xbf16>
    %c0_9 = arith.constant 0 : index
    %c0_10 = arith.constant 0 : index
    %63 = vector.load %arg3[%c0_9, %c0_10] : memref<32x128xbf16, #tpu.memory_space<vmem>>, vector<32x128xbf16>
    %cst_11 = arith.constant dense<0.000000e+00> : vector<16x128xf32>
    %64 = tpu.matmul %62, %63, %cst_11 {dimension_numbers = #tpu.dot_dimension_numbers<[1], [0], [0], [1], [0, 0, 1, 1], [], []>} : vector<16x32xbf16>, vector<32x128xbf16>, vector<16x128xf32> -> vector<16x128xf32>
    %c0_12 = arith.constant 0 : index
    %c0_13 = arith.constant 0 : index
    %65 = vector.load %arg4[%c0_12, %c0_13] : memref<1x128xf32, #tpu.memory_space<vmem>>, vector<1x128xf32>
    %66 = vector.broadcast %65 : vector<1x128xf32> to vector<16x128xf32>
    %67 = arith.addf %64, %66 : vector<16x128xf32>
    %68 = arith.addf %67, %0 : vector<16x128xf32>
    %69 = arith.truncf %68 : vector<16x128xf32> to vector<16x128xbf16>
    %c0_14 = arith.constant 0 : index
    %c0_15 = arith.constant 0 : index
    %70 = vector.load %arg5[%c0_14, %c0_15] : memref<128x128xbf16, #tpu.memory_space<vmem>>, vector<128x128xbf16>
    %cst_16 = arith.constant dense<0.000000e+00> : vector<16x128xf32>
    %71 = tpu.matmul %69, %70, %cst_16 {dimension_numbers = #tpu.dot_dimension_numbers<[1], [0], [0], [1], [0, 0, 1, 1], [], []>} : vector<16x128xbf16>, vector<128x128xbf16>, vector<16x128xf32> -> vector<16x128xf32>
    %72 = arith.truncf %71 : vector<16x128xf32> to vector<16x128xbf16>
    %c0_17 = arith.constant 0 : index
    %c0_18 = arith.constant 0 : index
    %73 = vector.load %arg6[%c0_17, %c0_18] : memref<128x128xbf16, #tpu.memory_space<vmem>>, vector<128x128xbf16>
    %cst_19 = arith.constant dense<0.000000e+00> : vector<16x128xf32>
    %74 = tpu.matmul %72, %73, %cst_19 {dimension_numbers = #tpu.dot_dimension_numbers<[1], [0], [0], [1], [0, 0, 1, 1], [], []>} : vector<16x128xbf16>, vector<128x128xbf16>, vector<16x128xf32> -> vector<16x128xf32>
    %75 = arith.addf %74, %68 : vector<16x128xf32>
    %c0_20 = arith.constant 0 : index
    %c0_21 = arith.constant 0 : index
    %76 = vector.load %arg7[%c0_20, %c0_21] : memref<16x128xf32, #tpu.memory_space<vmem>>, vector<16x128xf32>
    tpu.vector_store %arg7[%c0_20, %c0_21], %75 {strides = array<i32>} : memref<16x128xf32, #tpu.memory_space<vmem>>, vector<16x128xf32>,
    return
  }
}

</mosaic_0001>

<bundles_post_ra>
// kernel: tpu_custom_call.1
= control target key start
LH: loop header
LB: loop body
LE: loop exit
PB: predicated region body
PF: predicated region fallthrough
CT: control target
= control target key end

     0   :  { %12 = vsyncpa [#allocation3], 0  ;;  %s2252_s0 = inlined_call_operand.hbm [shape: f32[16,128], index: 0, kind: input, shape index: {}]   ;;  %s2253_s1 = inlined_call_operand.vmem [shape: bf16[128,96], index: 1, kind: input, shape index: {}]   ;;  %s2254_s2 = inlined_call_operand.vmem [shape: f32[1,96], index: 2, kind: input, shape index: {}]   ;;  %s2255_s3 = inlined_call_operand.hbm [shape: bf16[32,128], index: 3, kind: input, shape index: {}]   ;;  %s2256_s4 = inlined_call_operand.vmem [shape: f32[1,128], index: 4, kind: input, shape index: {}]   ;;  %s2257_s5 = inlined_call_operand.vmem [shape: bf16[128,128], index: 5, kind: input, shape index: {}]   ;;  %s2258_s6 = inlined_call_operand.vmem [shape: bf16[128,128], index: 6, kind: input, shape index: {}]   ;;  %s2259_s7 = inlined_call_operand.hbm [shape: f32[16,128], index: 7, kind: output, shape index: {}]  }
   0x1   :  { %13 = vsyncpa [#allocation6], 0 }
   0x2   :  { %14 = vsyncpa [#allocation4], 0  ;;  %s1849_s24 = smov [#allocation2]   ;;  %s1777_s28 = scalar_lea.hbm %s2252_s0, 256 }
   0x3   :  { %s20_s25 = sshll.u32 %s1849_s24, 4  ;;  %p1778_p0 = scmp.ne.s32.totalorder %s2252_s0, %s1777_s28  ;;  %s21_s25 = int_to_ptr.vmem [resolvable:$true] %s20_s25 }
   0x4   :  { %p1781_p1 = scmp.lt.u32.totalorder %s1777_s28, %s2252_s0 }
   0x6   :  { %p1783_p2 = pnand %p1781_p1, %p1778_p0 }
   0x8   :  { %1786 = shalt.err (!%p1783_p2)
}
   0x9   :  { %s1787_s10 = scalar_lea.vmem %s21_s25, 256  ;;  %p1792_p4 = scmp.lt.s32.totalorder %s21_s25, %s21_s25 }
   0xa   :  { %p1788_p3 = scmp.ne.s32.totalorder %s21_s25, %s1787_s10  ;;  %p1793_p5 = scmp.lt.s32.totalorder %s1787_s10, %s1787_s10 }
   0xc   :  { %p1794_p6 = por %p1793_p5, %p1792_p4 }
   0xe   :  { %p1795_p7 = pnand %p1794_p6, %p1788_p3 }
  0x10   :  { %1798 = shalt.err (!%p1795_p7)
}
  0x11   :  { %s1850_s11 = smov 128   ;;  %s1851_s12 = smov 8  }
  0x12   :  { %26 = dma.hbm_to_vmem [thread:$0]  %s2252_s0, 256, %s21_s25, [#allocation3], %s1850_s11, %s1850_s11, %s1851_s12  }
  0x13   :  { %s1852_s15 = smov [#allocation5]   ;;  %s1799_s19 = scalar_lea.hbm %s2255_s3, 256 }
  0x14   :  { %s36_s16 = sshll.u32 %s1852_s15, 4  ;;  %p1800_p8 = scmp.ne.s32.totalorder %s2255_s3, %s1799_s19  ;;  %s37_s16 = int_to_ptr.vmem [resolvable:$true] %s36_s16 }
  0x15   :  { %p1803_p9 = scmp.lt.u32.totalorder %s1799_s19, %s2255_s3 }
  0x17   :  { %p1805_p10 = pnand %p1803_p9, %p1800_p8 }
  0x19   :  { %1808 = shalt.err (!%p1805_p10)
}
  0x1a   :  { %s1809_s24 = scalar_lea.vmem %s37_s16, 256  ;;  %p1814_p12 = scmp.lt.s32.totalorder %s37_s16, %s37_s16 }
  0x1b   :  { %p1810_p11 = scmp.ne.s32.totalorder %s37_s16, %s1809_s24  ;;  %p1815_p13 = scmp.lt.s32.totalorder %s1809_s24, %s1809_s24 }
  0x1d   :  { %p1816_p0 = por %p1815_p13, %p1814_p12 }
  0x1f   :  { %p1817_p1 = pnand %p1816_p0, %p1810_p11 }
  0x21   :  { %1820 = shalt.err (!%p1817_p1)
}
  0x22   :  { %s1853_s0 = smov 64   ;;  %s1854_s25 = smov 4  }
  0x23   :  { %42 = dma.hbm_to_vmem [thread:$0]  %s2255_s3, 256, %s37_s16, [#allocation6], %s1853_s0, %s1853_s0, %s1854_s25  }
  0x24   :  { %1843 = dma.done.wait [#allocation3], 256  }
  0x25   :  { %1844 = vsyncadd [#allocation3], 4294967040 }
  0x26   :  { %1845 = dma.done.wait [#allocation6], 256  }
  0x27   :  { %1846 = vsyncadd [#allocation6], 4294967040  ;;  %v1855_v0 = vmov 0.0   ;;  %vm1856_vm0 = vmmov 0   ;;  %v1719_v1 = vld [vmem:[%s2253_s1] sm:$0xff]   ;;  %v1720_v2 = vld [vmem:[%s2253_s1 + $0x8] sm:$0xff]  }
  0x28   :  { %1515 = vmatprep.subr.bf16.mxu0 %v1855_v0  ;;  %1531 = vmatprep.mubr.msk.bf16.mxu0 %vm1856_vm0, %v1855_v0  ;;  %v1721_v3 = vld [vmem:[%s2253_s1 + $0x10] sm:$0xff]   ;;  %v1722_v4 = vld [vmem:[%s2253_s1 + $0x18] sm:$0xff]   ;;  %v1723_v5 = vld [vmem:[%s2253_s1 + $0x20] sm:$0xff]   ;;  %s1858_s24 = smov 112   ;;  %s1859_s25 = smov 104   ;;  %vm202_vm1 = vcmask 64512  }
  0x29   :  { %1535 = vmatprep.subr.bf16.mxu1 %v1855_v0  ;;  %1537 = vmatprep.mubr.msk.bf16.mxu1 %vm1856_vm0, %v1855_v0  ;;  %v1724_v6 = vld [vmem:[%s2253_s1 + $0x28] sm:$0xff]   ;;  %v1725_v7 = vld [vmem:[%s2253_s1 + $0x30] sm:$0xff]   ;;  %v1726_v8 = vld [vmem:[%s2253_s1 + $0x38] sm:$0xff]   ;;  %s1857_s1 = smov 120   ;;  %s1860_s26 = smov 96   ;;  %vm693_vm2 = vcmask 1043456  }
  0x2a   :  { %1516 = vmatpush3.bf16.msra.mxu0 %v1719_v1  ;;  %v1969_v9 = vld [vmem:[#allocation2] sm:$0xff]  ;;  %v1971_v10 = vld [vmem:[#allocation2 + $0x8] sm:$0xff]  ;;  %s1862_s8 = smov 24   ;;  %vm1099_vm3 = vcmask 130048   ;;  %vm1102_vm4 = vcmask 195584   ;;  %vm1129_vm5 = vcmask 261120  }
  0x2b   :  { %1517 = vmatprep.subr.bf16.mxu0 %v1855_v0  ;;  %v58_v11 = vpack.c.bf16 %v1971_v10, %v1969_v9  ;;  %v1408_v12 = vld [vmem:[%s2254_s2] ss:$0 sm:$0xff]  ;;  %s1861_s2 = smov 16  }
  0x2e   :  { %1518 = vmatpush3.bf16.msra.mxu0 %v1720_v2 }
  0x2f   :  { %1519 = vmatprep.subr.bf16.mxu0 %v1855_v0 }
  0x32   :  { %1520 = vmatpush3.bf16.msra.mxu0 %v1721_v3 }
  0x33   :  { %1521 = vmatprep.subr.bf16.mxu0 %v1855_v0 }
  0x36   :  { %1522 = vmatpush3.bf16.msra.mxu0 %v1722_v4 }
  0x37   :  { %1523 = vmatprep.subr.bf16.mxu0 %v1855_v0 }
  0x3a   :  { %1524 = vmatpush3.bf16.msra.mxu0 %v1723_v5 }
  0x3b   :  { %1525 = vmatprep.subr.bf16.mxu0 %v1855_v0 }
  0x3e   :  { %1526 = vmatpush3.bf16.msra.mxu0 %v1724_v6 }
  0x3f   :  { %1527 = vmatprep.subr.bf16.mxu0 %v1855_v0 }
  0x42   :  { %1528 = vmatpush3.bf16.msra.mxu0 %v1725_v7 }
  0x43   :  { %1529 = vmatprep.subr.bf16.mxu0 %v1855_v0 }
  0x46   :  { %1530 = vmatpush3.bf16.msra.mxu0 %v1726_v8 }
  0x47   :  { %1559 = vmatprep.subr.bf16.mxu0 %v1855_v0 }
  0x49   :  { %1532 = vmatmul.mubr.bf16.vlgmr.msra.gmra.mrb[0].mxu0 %v58_v11 }
  0x4a   :  { %1561 = vmatprep.mubr.msk.bf16.mxu0 %vm1856_vm0, %v1855_v0 }
 0x11c   :  { %v164_v13 = vpop.f32.mrb[0].mxu0 }
 0x11d   :  { %v165_v14 = vadd.f32 %v1408_v12, %v164_v13  ;;  %v1533_v15 = vpop.f32.mrb[1].mxu0 }
 0x11e   :  { %v167_v16 = vpop.f32.mrb[2].mxu0 }
 0x11f   :  { %v168_v17 = vadd.f32 %v1408_v12, %v167_v16  ;;  %173 = vrot.lane.b32.xlu0 %v165_v14, %s1857_s1  ;;  %v1534_v18 = vpop.f32.mrb[3].mxu0  ;;  %v191_v20 = vpack.c.bf16 %v165_v14, %v165_v14 }
 0x121   :  { %v1694_v19 = vpack.i.bf16 %v168_v17, %v165_v14  ;;  %v1982_v21 = vpack.c.bf16 %v168_v17, %v168_v17 }
 0x123   :  { %1695 = vrot.lane.b32.xlu1 %v1694_v19, %s1858_s24  ;;  %175 = vrot.lane.b32.xlu0 %v168_v17, %s1857_s1 }
 0x127   :  { %1700 = vrot.lane.b32.xlu1 %v1694_v19, %s1859_s25  ;;  %200 = vrot.lane.b32.xlu0 %v191_v20, %s1860_s26 }
 0x12b   :  { %250 = vrot.lane.b32.xlu1 %v1982_v21, %s1860_s26 }
 0x191   :  { %v174_v22 = vpop.permute.xlu0 %173 }
 0x192   :  { %v1985_v23 = vpack.c.bf16 %v174_v22, %v174_v22 }
 0x194   :  { %299 = vrot.lane.b32.xlu0 %v1985_v23, %s1860_s26 }
 0x195   :  { %v1696_v24 = vpop.permute.xlu1 %1695  ;;  %v176_v25 = vpop.permute.xlu0 %175 }
 0x196   :  { %v1698_v26 = vunpack.i.h.bf16 %v1696_v24  ;;  %v1697_v27 = vunpack.i.l.bf16 %v1696_v24  ;;  %v1988_v28 = vpack.c.bf16 %v176_v25, %v176_v25 }
 0x198   :  { %v1990_v29 = vpack.c.bf16 %v1697_v27, %v1697_v27  ;;  %348 = vrot.lane.b32.xlu1 %v1988_v28, %s1860_s26  ;;  %v1993_v32 = vpack.c.bf16 %v1698_v26, %v1698_v26 }
 0x199   :  { %v1701_v30 = vpop.permute.xlu1 %1700  ;;  %v201_v31 = vpop.permute.xlu0 %200 }
 0x19a   :  { %v1703_v33 = vunpack.i.h.bf16 %v1701_v30  ;;  %v1702_v34 = vunpack.i.l.bf16 %v1701_v30  ;;  %397 = vrot.lane.b32.xlu0 %v1990_v29, %s1860_s26  ;;  %v207_v35 = vsel %vm202_vm1, %v201_v31, 0 }
 0x19b   :  { %1536 = vmatpush3.bf16.xpose.msra.mxu1 %v207_v35 }
 0x19c   :  { %v1997_v36 = vpack.c.bf16 %v1702_v34, %v1702_v34  ;;  %446 = vrot.lane.b32.xlu1 %v1993_v32, %s1860_s26  ;;  %1541 = vmatprep.subr.bf16.mxu1 %v1855_v0  ;;  %v2001_v37 = vpack.c.bf16 %v1703_v33, %v1703_v33 }
 0x19d   :  { %v251_v38 = vpop.permute.xlu1 %250 }
 0x19e   :  { %495 = vrot.lane.b32.xlu0 %v1997_v36, %s1860_s26  ;;  %v256_v39 = vsel %vm202_vm1, %v251_v38, 0 }
 0x1a0   :  { %544 = vrot.lane.b32.xlu1 %v2001_v37, %s1860_s26 }
 0x1a2   :  { %1538 = vmatmul.mubr.msk.bf16.vlgmr.msra.gmra.mrb[0].mxu1 %vm202_vm1, %v191_v20 }
 0x1a3   :  { %1542 = vmatpush3.bf16.xpose.msra.mxu1 %v256_v39  ;;  %1543 = vmatprep.mubr.msk.bf16.mxu1 %vm1856_vm0, %v1855_v0 }
 0x1a4   :  { %688 = vrot.lane.b32.xlu1 %v191_v20, %s1853_s0  ;;  %1547 = vmatprep.subr.bf16.mxu1 %v1855_v0 }
 0x1aa   :  { %1544 = vmatmul.mubr.msk.bf16.vlgmr.msra.gmra.mrb[4].mxu1 %vm202_vm1, %v1982_v21 }
 0x1ab   :  { %1549 = vmatprep.mubr.msk.bf16.mxu1 %vm1856_vm0, %v1855_v0 }
 0x206   :  { %v300_v40 = vpop.permute.xlu0 %299 }
 0x207   :  { %v305_v41 = vsel %vm202_vm1, %v300_v40, 0 }
 0x208   :  { %1548 = vmatpush3.bf16.xpose.msra.mxu1 %v305_v41 }
 0x209   :  { %1553 = vmatprep.subr.bf16.mxu1 %v1855_v0 }
 0x20a   :  { %v349_v42 = vpop.permute.xlu1 %348 }
 0x20b   :  { %v354_v46 = vsel %vm202_vm1, %v349_v42, 0 }
 0x20c   :  { %v398_v43 = vpop.permute.xlu0 %397 }
 0x20d   :  { %v403_v44 = vsel %vm202_vm1, %v398_v43, 0 }
 0x20e   :  { %1560 = vmatpush3.bf16.xpose.msra.mxu0 %v403_v44  ;;  %v447_v45 = vpop.permute.xlu1 %446 }
 0x20f   :  { %1550 = vmatmul.mubr.msk.bf16.vlgmr.msra.gmra.mrb[8].mxu1 %vm202_vm1, %v1985_v23  ;;  %1571 = vmatprep.subr.bf16.mxu0 %v1855_v0  ;;  %v452_v50 = vsel %vm202_vm1, %v447_v45, 0 }
 0x210   :  { %1554 = vmatpush3.bf16.xpose.msra.mxu1 %v354_v46  ;;  %1555 = vmatprep.mubr.msk.bf16.mxu1 %vm1856_vm0, %v1855_v0  ;;  %v496_v47 = vpop.permute.xlu0 %495 }
 0x211   :  { %1565 = vmatprep.subr.bf16.mxu1 %v1855_v0  ;;  %v501_v49 = vsel %vm202_vm1, %v496_v47, 0 }
 0x212   :  { %v545_v48 = vpop.permute.xlu1 %544 }
 0x213   :  { %v550_v53 = vsel %vm202_vm1, %v545_v48, 0 }
 0x215   :  { %1562 = vmatmul.mubr.msk.bf16.vlgmr.msra.gmra.mrb[4].mxu0 %vm202_vm1, %v1990_v29 }
 0x216   :  { %1572 = vmatpush3.bf16.xpose.msra.mxu0 %v501_v49  ;;  %1573 = vmatprep.mubr.msk.bf16.mxu0 %vm1856_vm0, %v1855_v0  ;;  %v689_v51 = vpop.permute.xlu1 %688 }
 0x217   :  { %1556 = vmatmul.mubr.msk.bf16.vlgmr.msra.gmra.mrb[12].mxu1 %vm202_vm1, %v1988_v28  ;;  %1583 = vmatprep.subr.bf16.mxu0 %v1855_v0  ;;  %v695_v52 = vsel %vm693_vm2, %v689_v51, 0 }
 0x218   :  { %1566 = vmatpush3.bf16.xpose.msra.mxu1 %v452_v50  ;;  %1567 = vmatprep.mubr.msk.bf16.mxu1 %vm1856_vm0, %v1855_v0 }
 0x219   :  { %1577 = vmatprep.subr.bf16.mxu1 %v1855_v0 }
 0x21d   :  { %1574 = vmatmul.mubr.msk.bf16.vlgmr.msra.gmra.mrb[8].mxu0 %vm202_vm1, %v1997_v36 }
 0x21e   :  { %1584 = vmatpush3.bf16.msra.mxu0 %v695_v52  ;;  %1585 = vmatprep.mubr.msk.bf16.mxu0 %vm1856_vm0, %v1855_v0 }
 0x21f   :  { %1568 = vmatmul.mubr.msk.bf16.vlgmr.msra.gmra.mrb[16].mxu1 %vm202_vm1, %v1993_v32  ;;  %1595 = vmatprep.subr.bf16.mxu0 %v1855_v0 }
 0x220   :  { %1578 = vmatpush3.bf16.xpose.msra.mxu1 %v550_v53  ;;  %1579 = vmatprep.mubr.msk.bf16.mxu1 %vm1856_vm0, %v1855_v0 }
 0x221   :  { %1589 = vmatprep.subr.bf16.mxu1 %v1855_v0 }
 0x227   :  { %1580 = vmatmul.mubr.msk.bf16.vlgmr.msra.gmra.mrb[20].mxu1 %vm202_vm1, %v2001_v37 }
 0x228   :  { %1591 = vmatprep.mubr.msk.bf16.mxu1 %vm1856_vm0, %v1855_v0 }
 0x275   :  { %v243_v54 = vpop.f32.mrb[0].mxu1 }
 0x276   :  { %v1539_v55 = vpop.f32.mrb[1].mxu1  ;;  %v592_v56 = vsel %vm202_vm1, %v243_v54, -inf }
 0x277   :  { %593 = vmax.xlane.f32.xlu0 %v592_v56  ;;  %v246_v57 = vpop.f32.mrb[2].mxu1 }
 0x278   :  { %v1540_v58 = vpop.f32.mrb[3].mxu1 }
 0x27d   :  { %v292_v59 = vpop.f32.mrb[4].mxu1 }
 0x27e   :  { %v1545_v60 = vpop.f32.mrb[5].mxu1  ;;  %v595_v61 = vsel %vm202_vm1, %v292_v59, -inf }
 0x27f   :  { %596 = vmax.xlane.f32.xlu1 %v595_v61  ;;  %v295_v62 = vpop.f32.mrb[6].mxu1 }
 0x280   :  { %v1546_v63 = vpop.f32.mrb[7].mxu1 }
 0x2e2   :  { %v341_v1 = vpop.f32.mrb[8].mxu1 }
 0x2e3   :  { %v1551_v2 = vpop.f32.mrb[9].mxu1  ;;  %v598_v3 = vsel %vm202_vm1, %v341_v1, -inf }
 0x2e4   :  { %599 = vmax.xlane.f32.xlu0 %v598_v3  ;;  %v344_v4 = vpop.f32.mrb[10].mxu1 }
 0x2e5   :  { %v1552_v5 = vpop.f32.mrb[11].mxu1 }
 0x2e8   :  { %v439_v6 = vpop.f32.mrb[4].mxu0 }
 0x2e9   :  { %v1563_v7 = vpop.f32.mrb[5].mxu0  ;;  %v604_v8 = vsel %vm202_vm1, %v439_v6, -inf }
 0x2ea   :  { %v390_v11 = vpop.f32.mrb[12].mxu1  ;;  %605 = vmax.xlane.f32.xlu1 %v604_v8  ;;  %v442_v12 = vpop.f32.mrb[6].mxu0 }
 0x2eb   :  { %v1557_v13 = vpop.f32.mrb[13].mxu1  ;;  %v1564_v14 = vpop.f32.mrb[7].mxu0  ;;  %v601_v15 = vsel %vm202_vm1, %v390_v11, -inf }
 0x2ec   :  { %602 = vmax.xlane.f32.xlu0 %v601_v15  ;;  %v393_v16 = vpop.f32.mrb[14].mxu1 }
 0x2ed   :  { %v1558_v17 = vpop.f32.mrb[15].mxu1 }
 0x2f0   :  { %v2058_v18 = vpop.f32.mrb[8].mxu0 }
 0x2f1   :  { %v1575_v19 = vpop.f32.mrb[9].mxu0  ;;  %v610_v20 = vsel %vm202_vm1, %v2058_v18, -inf }
 0x2f2   :  { %v2062_v22 = vpop.f32.mrb[16].mxu1  ;;  %611 = vmax.xlane.f32.xlu1 %v610_v20  ;;  %v540_v24 = vpop.f32.mrb[10].mxu0 }
 0x2f3   :  { %v1569_v25 = vpop.f32.mrb[17].mxu1  ;;  %v1576_v26 = vpop.f32.mrb[11].mxu0  ;;  %v607_v27 = vsel %vm202_vm1, %v2062_v22, -inf }
 0x2f4   :  { %608 = vmax.xlane.f32.xlu0 %v607_v27  ;;  %v491_v30 = vpop.f32.mrb[18].mxu1 }
 0x2f5   :  { %v1570_v31 = vpop.f32.mrb[19].mxu1 }
 0x2fa   :  { %v586_v33 = vpop.f32.mrb[20].mxu1 }
 0x2fb   :  { %v1581_v34 = vpop.f32.mrb[21].mxu1  ;;  %v613_v35 = vsel %vm202_vm1, %v586_v33, -inf }
 0x2fc   :  { %614 = vmax.xlane.f32.xlu0 %v613_v35  ;;  %v589_v38 = vpop.f32.mrb[22].mxu1 }
 0x2fd   :  { %v1582_v39 = vpop.f32.mrb[23].mxu1 }
 0x303   :  { %785 = vrot.lane.b32.xlu1 %v1985_v23, %s1853_s0 }
 0x304   :  { %v594_v40 = vpop.xlane.xlu0 %593 }
 0x305   :  { %v616_v41 = vsub.f32 %v243_v54, %v594_v40 }
 0x307   :  { %833 = vrot.lane.b32.xlu1 %v1988_v28, %s1853_s0  ;;  %v624_v43 = vmul.f32 1.442695, %v616_v41 }
 0x309   :  { %1745 = vpow2.f32 %v624_v43 }
 0x30c   :  { %v597_v42 = vpop.xlane.xlu1 %596 }
 0x30d   :  { %v617_v44 = vsub.f32 %v292_v59, %v597_v42 }
 0x30f   :  { %v626_v45 = vmul.f32 1.442695, %v617_v44 }
 0x311   :  { %1747 = vpow2.f32 %v626_v45 }
 0x312   :  { %737 = vrot.lane.b32.xlu0 %v1982_v21, %s1853_s0 }
 0x313   :  { %v1746_v46 = vpop.eup %1745 }
 0x314   :  { %v640_v47 = vsel %vm202_vm1, %v1746_v46, 0.0 }
 0x31b   :  { %v2074_v48 = vpop.eup %1747 }
 0x31c   :  { %v643_v23 = vsel %vm202_vm1, %v2074_v48, 0.0 }
 0x32b   :  { %641 = vadd.xlane.f32.xlu1 %v640_v47 }
 0x331   :  { %644 = vadd.xlane.f32.xlu0 %v643_v23 }
 0x371   :  { %v600_v28 = vpop.xlane.xlu0 %599 }
 0x372   :  { %v618_v49 = vsub.f32 %v341_v1, %v600_v28 }
 0x374   :  { %v628_v21 = vmul.f32 1.442695, %v618_v49 }
 0x376   :  { %1749 = vpow2.f32 %v628_v21 }
 0x377   :  { %v606_v50 = vpop.xlane.xlu1 %605 }
 0x378   :  { %v620_v51 = vsub.f32 %v439_v6, %v606_v50 }
 0x379   :  { %v603_v52 = vpop.xlane.xlu0 %602 }
 0x37a   :  { %v632_v53 = vmul.f32 1.442695, %v620_v51  ;;  %v619_v54 = vsub.f32 %v390_v11, %v603_v52 }
 0x37c   :  { %1751 = vpow2.f32 %v632_v53  ;;  %v630_v55 = vmul.f32 1.442695, %v619_v54 }
 0x37e   :  { %1753 = vpow2.f32 %v630_v55 }
 0x37f   :  { %v612_v3 = vpop.xlane.xlu1 %611 }
 0x380   :  { %v2078_v56 = vpop.eup %1749  ;;  %v622_v4 = vsub.f32 %v2058_v18, %v612_v3 }
 0x381   :  { %v646_v57 = vsel %vm202_vm1, %v2078_v56, 0.0  ;;  %v609_v58 = vpop.xlane.xlu0 %608 }
 0x382   :  { %647 = vadd.xlane.f32.xlu1 %v646_v57  ;;  %v621_v5 = vsub.f32 %v2062_v22, %v609_v58  ;;  %v636_v6 = vmul.f32 1.442695, %v622_v4 }
 0x383   :  { %v786_v11 = vpop.permute.xlu1 %785 }
 0x384   :  { %v634_v7 = vmul.f32 1.442695, %v621_v5  ;;  %1755 = vpow2.f32 %v636_v6  ;;  %v791_v25 = vsel %vm693_vm2, %v786_v11, 0 }
 0x386   :  { %v2082_v59 = vpop.eup %1751  ;;  %1757 = vpow2.f32 %v634_v7 }
 0x387   :  { %v652_v60 = vsel %vm202_vm1, %v2082_v59, 0.0  ;;  %v834_v13 = vpop.permute.xlu1 %833 }
 0x388   :  { %v2086_v61 = vpop.eup %1753  ;;  %653 = vadd.xlane.f32.xlu1 %v652_v60  ;;  %v839_v31 = vsel %vm693_vm2, %v834_v13, 0 }
 0x389   :  { %v615_v62 = vpop.xlane.xlu0 %614  ;;  %v649_v63 = vsel %vm202_vm1, %v2086_v61, 0.0 }
 0x38a   :  { %650 = vadd.xlane.f32.xlu0 %v649_v63  ;;  %v623_v8 = vsub.f32 %v586_v33, %v615_v62 }
 0x38c   :  { %v638_v12 = vmul.f32 1.442695, %v623_v8 }
 0x38d   :  { %v738_v1 = vpop.permute.xlu0 %737 }
 0x38e   :  { %v743_v2 = vsel %vm693_vm2, %v738_v1, 0  ;;  %1759 = vpow2.f32 %v638_v12  ;;  %v2098_v15 = vpop.eup %1755 }
 0x38f   :  { %1590 = vmatpush3.bf16.msra.mxu1 %v743_v2 }
 0x390   :  { %1601 = vmatprep.subr.bf16.mxu1 %v1855_v0 }
 0x399   :  { %929 = vrot.lane.b32.xlu1 %v1993_v32, %s1853_s0  ;;  %v2100_v32 = vpop.eup %1757 }
 0x39a   :  { %v655_v17 = vsel %vm202_vm1, %v2100_v32, 0.0  ;;  %v2106_v18 = vpop.eup %1759 }
 0x39b   :  { %v661_v19 = vsel %vm202_vm1, %v2106_v18, 0.0 }
 0x3a0   :  { %881 = vrot.lane.b32.xlu0 %v1990_v29, %s1853_s0  ;;  %v658_v29 = vsel %vm202_vm1, %v2098_v15, 0.0 }
 0x3b8   :  { %v642_v14 = vpop.xlane.xlu1 %641 }
 0x3b9   :  { %1761 = vrcp.f32 %v642_v14 }
 0x3bd   :  { %659 = vadd.xlane.f32.xlu1 %v658_v29 }
 0x3be   :  { %v645_v16 = vpop.xlane.xlu0 %644 }
 0x3bf   :  { %1763 = vrcp.f32 %v645_v16  ;;  %656 = vadd.xlane.f32.xlu0 %v655_v17 }
 0x3c3   :  { %v1762_v20 = vpop.eup %1761  ;;  %662 = vadd.xlane.f32.xlu0 %v661_v19 }
 0x3c4   :  { %v672_v22 = vmul.f32 %v1762_v20, %v1746_v46  ;;  %v1727_v20 = vld [vmem:[#allocation5] sm:$0xff]  }
 0x3c6   :  { %v680_v24 = vpack.c.bf16 %v672_v22, %v672_v22 }
 0x3c8   :  { %1586 = vmatmul.mubr.msk.bf16.vlgmr.msra.gmra.mrb[12].mxu0 %vm202_vm1, %v680_v24 }
 0x3c9   :  { %v1764_v26 = vpop.eup %1763  ;;  %1596 = vmatpush3.bf16.msra.mxu0 %v791_v25  ;;  %1597 = vmatprep.mubr.msk.bf16.mxu0 %vm1856_vm0, %v1855_v0  ;;  %v1728_v25 = vld [vmem:[#allocation5 + $0x8] sm:$0xff]  }
 0x3ca   :  { %v673_v27 = vmul.f32 %v1764_v26, %v2074_v48  ;;  %1607 = vmatprep.subr.bf16.mxu0 %v1855_v0 }
 0x3cc   :  { %v681_v30 = vpack.c.bf16 %v673_v27, %v673_v27 }
 0x3ce   :  { %1592 = vmatmul.mubr.msk.bf16.vlgmr.msra.gmra.mrb[24].mxu1 %vm202_vm1, %v681_v30  ;;  %1025 = vrot.lane.b32.xlu1 %v2001_v37, %s1853_s0 }
 0x3cf   :  { %1602 = vmatpush3.bf16.msra.mxu1 %v839_v31  ;;  %1603 = vmatprep.mubr.msk.bf16.mxu1 %vm1856_vm0, %v1855_v0 }
 0x3d0   :  { %1613 = vmatprep.subr.bf16.mxu1 %v1855_v0 }
 0x3d9   :  { %977 = vrot.lane.b32.xlu0 %v1997_v36, %s1853_s0 }
 0x40f   :  { %v648_v33 = vpop.xlane.xlu1 %647 }
 0x410   :  { %1765 = vrcp.f32 %v648_v33 }
 0x415   :  { %v654_v34 = vpop.xlane.xlu1 %653 }
 0x416   :  { %1767 = vrcp.f32 %v654_v34 }
 0x417   :  { %v651_v35 = vpop.xlane.xlu0 %650 }
 0x418   :  { %1769 = vrcp.f32 %v651_v35 }
 0x419   :  { %v930_v45 = vpop.permute.xlu1 %929 }
 0x41a   :  { %v1766_v38 = vpop.eup %1765  ;;  %v935_v48 = vsel %vm693_vm2, %v930_v45, 0  ;;  %v1733_v45 = vld [vmem:[%s2257_s5 + $0x20] sm:$0xff]  }
 0x41b   :  { %v674_v39 = vmul.f32 %v1766_v38, %v2078_v56  ;;  %v882_v40 = vpop.permute.xlu0 %881  ;;  %v1729_v38 = vld [vmem:[%s2257_s5] sm:$0xff]  }
 0x41c   :  { %v887_v41 = vsel %vm693_vm2, %v882_v40, 0 }
 0x41d   :  { %v682_v37 = vpack.c.bf16 %v674_v39, %v674_v39  ;;  %v1730_v39 = vld [vmem:[%s2257_s5 + $0x8] sm:$0xff]  }
 0x41f   :  { %1598 = vmatmul.mubr.msk.bf16.vlgmr.msra.gmra.mrb[16].mxu0 %vm202_vm1, %v682_v37 }
 0x420   :  { %v1768_v42 = vpop.eup %1767  ;;  %1608 = vmatpush3.bf16.msra.mxu0 %v887_v41  ;;  %1609 = vmatprep.mubr.msk.bf16.mxu0 %vm1856_vm0, %v1855_v0 }
 0x421   :  { %v676_v36 = vmul.f32 %v1768_v42, %v2082_v59  ;;  %1619 = vmatprep.subr.bf16.mxu0 %v1855_v0  ;;  %v1731_v42 = vld [vmem:[%s2257_s5 + $0x10] sm:$0xff]  }
 0x422   :  { %v1770_v43 = vpop.eup %1769 }
 0x423   :  { %v675_v44 = vmul.f32 %v1770_v43, %v2086_v61  ;;  %v684_v47 = vpack.c.bf16 %v676_v36, %v676_v36 }
 0x425   :  { %v683_v46 = vpack.c.bf16 %v675_v44, %v675_v44  ;;  %v1732_v44 = vld [vmem:[%s2257_s5 + $0x18] sm:$0xff]  }
 0x427   :  { %1604 = vmatmul.mubr.msk.bf16.vlgmr.msra.gmra.mrb[28].mxu1 %vm202_vm1, %v683_v46  ;;  %1610 = vmatmul.mubr.msk.bf16.vlgmr.msra.gmra.mrb[20].mxu0 %vm202_vm1, %v684_v47  ;;  %v1734_v46 = vld [vmem:[%s2257_s5 + $0x28] sm:$0xff]  }
 0x428   :  { %1614 = vmatpush3.bf16.msra.mxu1 %v935_v48  ;;  %1621 = vmatprep.mubr.msk.bf16.mxu0 %vm1856_vm0, %v1855_v0 }
 0x429   :  { %1615 = vmatprep.mubr.msk.bf16.mxu1 %vm1856_vm0, %v1855_v0  ;;  %1625 = vmatprep.subr.bf16.mxu1 %v1855_v0 }
 0x44a   :  { %v660_v23 = vpop.xlane.xlu1 %659 }
 0x44b   :  { %1771 = vrcp.f32 %v660_v23 }
 0x44c   :  { %v657_v28 = vpop.xlane.xlu0 %656 }
 0x44d   :  { %1773 = vrcp.f32 %v657_v28 }
 0x44e   :  { %v1026_v56 = vpop.permute.xlu1 %1025 }
 0x44f   :  { %v1031_v59 = vsel %vm693_vm2, %v1026_v56, 0 }
 0x450   :  { %v663_v49 = vpop.xlane.xlu0 %662 }
 0x451   :  { %1775 = vrcp.f32 %v663_v49 }
 0x454   :  { %v978_v21 = vpop.permute.xlu0 %977 }
 0x455   :  { %v1772_v50 = vpop.eup %1771  ;;  %v983_v51 = vsel %vm693_vm2, %v978_v21, 0 }
 0x456   :  { %v678_v52 = vmul.f32 %v1772_v50, %v2098_v15  ;;  %1620 = vmatpush3.bf16.msra.mxu0 %v983_v51 }
 0x457   :  { %v1774_v53 = vpop.eup %1773  ;;  %1631 = vmatprep.subr.bf16.mxu0 %v1855_v0 }
 0x458   :  { %v677_v54 = vmul.f32 %v1774_v53, %v2100_v32  ;;  %v686_v55 = vpack.c.bf16 %v678_v52, %v678_v52 }
 0x45a   :  { %1622 = vmatmul.mubr.msk.bf16.vlgmr.msra.gmra.mrb[24].mxu0 %vm202_vm1, %v686_v55  ;;  %v685_v57 = vpack.c.bf16 %v677_v54, %v677_v54 }
 0x45b   :  { %v1776_v58 = vpop.eup %1775  ;;  %1635 = vmatprep.mubr.msk.bf16.mxu0 %vm1856_vm0, %v1855_v0  ;;  %1632 = vmatpush3.bf16.msra.mxu0 %v1727_v20 }
 0x45c   :  { %1616 = vmatmul.mubr.msk.bf16.vlgmr.msra.gmra.mrb[32].mxu1 %vm202_vm1, %v685_v57  ;;  %v679_v60 = vmul.f32 %v1776_v58, %v2106_v18  ;;  %1633 = vmatprep.subr.bf16.mxu0 %v1855_v0 }
 0x45d   :  { %1626 = vmatpush3.bf16.msra.mxu1 %v1031_v59  ;;  %1627 = vmatprep.mubr.msk.bf16.mxu1 %vm1856_vm0, %v1855_v0 }
 0x45e   :  { %1639 = vmatprep.subr.bf16.mxu1 %v1855_v0  ;;  %v687_v61 = vpack.c.bf16 %v679_v60, %v679_v60  ;;  %v1735_v60 = vld [vmem:[%s2257_s5 + $0x30] sm:$0xff]  }
 0x45f   :  { %1634 = vmatpush3.bf16.msra.mxu0 %v1728_v25 }
 0x460   :  { %1659 = vmatprep.subr.bf16.mxu0 %v1855_v0 }
 0x464   :  { %1628 = vmatmul.mubr.msk.bf16.vlgmr.msra.gmra.mrb[36].mxu1 %vm202_vm1, %v687_v61  ;;  %v1736_v61 = vld [vmem:[%s2257_s5 + $0x38] sm:$0xff]  }
 0x465   :  { %1655 = vmatprep.mubr.msk.bf16.mxu1 %vm1856_vm0, %v1855_v0  ;;  %1640 = vmatpush3.bf16.msra.mxu1 %v1729_v38 }
 0x466   :  { %1641 = vmatprep.subr.bf16.mxu1 %v1855_v0 }
 0x469   :  { %1642 = vmatpush3.bf16.msra.mxu1 %v1730_v39 }
 0x46a   :  { %1643 = vmatprep.subr.bf16.mxu1 %v1855_v0 }
 0x46d   :  { %1644 = vmatpush3.bf16.msra.mxu1 %v1731_v42 }
 0x46e   :  { %1645 = vmatprep.subr.bf16.mxu1 %v1855_v0 }
 0x471   :  { %1646 = vmatpush3.bf16.msra.mxu1 %v1732_v44 }
 0x472   :  { %1647 = vmatprep.subr.bf16.mxu1 %v1855_v0 }
 0x475   :  { %1648 = vmatpush3.bf16.msra.mxu1 %v1733_v45 }
 0x476   :  { %1649 = vmatprep.subr.bf16.mxu1 %v1855_v0 }
 0x479   :  { %1650 = vmatpush3.bf16.msra.mxu1 %v1734_v46 }
 0x47a   :  { %1651 = vmatprep.subr.bf16.mxu1 %v1855_v0 }
 0x47d   :  { %1652 = vmatpush3.bf16.msra.mxu1 %v1735_v60 }
 0x47e   :  { %1653 = vmatprep.subr.bf16.mxu1 %v1855_v0 }
 0x481   :  { %1654 = vmatpush3.bf16.msra.mxu1 %v1736_v61 }
 0x49b   :  { %v2157_v62 = vpop.f32.mrb[12].mxu0 }
 0x49c   :  { %v1587_v63 = vpop.f32.mrb[13].mxu0 }
 0x49d   :  { %v734_v1 = vpop.f32.mrb[14].mxu0  ;;  %v1738_v63 = vld [vmem:[%s2258_s6 + $0x8] sm:$0xff]  }
 0x49e   :  { %v1588_v2 = vpop.f32.mrb[15].mxu0  ;;  %v1739_v1 = vld [vmem:[%s2258_s6 + $0x10] sm:$0xff]  }
 0x49f   :  { %v1740_v2 = vld [vmem:[%s2258_s6 + $0x18] sm:$0xff]  }
 0x4a1   :  { %v2159_v3 = vpop.f32.mrb[24].mxu1 }
 0x4a2   :  { %v1593_v4 = vpop.f32.mrb[25].mxu1 }
 0x4a3   :  { %v782_v5 = vpop.f32.mrb[26].mxu1  ;;  %v1742_v4 = vld [vmem:[%s2258_s6 + $0x28] sm:$0xff]  }
 0x4a4   :  { %v1594_v6 = vpop.f32.mrb[27].mxu1  ;;  %v1743_v5 = vld [vmem:[%s2258_s6 + $0x30] sm:$0xff]  }
 0x4a5   :  { %v1433_v6 = vld [vmem:[%s2256_s4] ss:$0 sm:$0xff]  ;;  %s1863_s4 = smov [#allocation7]  }
 0x4a6   :  { %s1395_s13 = sshll.u32 %s1863_s4, 4  ;;  %s1396_s13 = int_to_ptr.vmem [resolvable:$true] %s1395_s13 }
 0x4a7   :  { %s1821_s14 = scalar_lea.vmem %s1396_s13, 256  ;;  %p1826_p3 = scmp.lt.s32.totalorder %s1396_s13, %s1396_s13 }
 0x4a8   :  { %p1822_p2 = scmp.ne.s32.totalorder %s1396_s13, %s1821_s14  ;;  %p1827_p4 = scmp.lt.s32.totalorder %s1821_s14, %s1821_s14 }
 0x4aa   :  { %p1828_p5 = por %p1827_p4, %p1826_p3 }
 0x4ac   :  { %p1829_p6 = pnand %p1828_p5, %p1822_p2 }
 0x4f2   :  { %v827_v7 = vpop.f32.mrb[16].mxu0 }
 0x4f3   :  { %v1599_v8 = vpop.f32.mrb[17].mxu0 }
 0x4f4   :  { %v830_v11 = vpop.f32.mrb[18].mxu0 }
 0x4f5   :  { %v1600_v12 = vpop.f32.mrb[19].mxu0 }
 0x4fa   :  { %v875_v13 = vpop.f32.mrb[28].mxu1  ;;  %v923_v14 = vpop.f32.mrb[20].mxu0 }
 0x4fb   :  { %v1704_v15 = vpack.i.bf16 %v875_v13, %v827_v7  ;;  %v1605_v32 = vpop.f32.mrb[29].mxu1  ;;  %v1611_v29 = vpop.f32.mrb[21].mxu0 }
 0x4fc   :  { %v878_v16 = vpop.f32.mrb[30].mxu1  ;;  %v926_v17 = vpop.f32.mrb[22].mxu0 }
 0x4fd   :  { %v1606_v18 = vpop.f32.mrb[31].mxu1  ;;  %1705 = vrot.lane.b32.xlu0 %v1704_v15, %s1851_s12  ;;  %v1612_v19 = vpop.f32.mrb[23].mxu0 }
 0x52d   :  { %v1019_v22 = vpop.f32.mrb[24].mxu0 }
 0x52e   :  { %v1623_v24 = vpop.f32.mrb[25].mxu0 }
 0x52f   :  { %v971_v26 = vpop.f32.mrb[32].mxu1  ;;  %v1022_v27 = vpop.f32.mrb[26].mxu0 }
 0x530   :  { %v1709_v30 = vpack.i.bf16 %v971_v26, %v923_v14  ;;  %v1617_v31 = vpop.f32.mrb[33].mxu1  ;;  %v1624_v33 = vpop.f32.mrb[27].mxu0 }
 0x531   :  { %v974_v34 = vpop.f32.mrb[34].mxu1 }
 0x532   :  { %v1618_v35 = vpop.f32.mrb[35].mxu1  ;;  %1710 = vrot.lane.b32.xlu1 %v1709_v30, %s1861_s2 }
 0x537   :  { %v1067_v40 = vpop.f32.mrb[36].mxu1 }
 0x538   :  { %v1714_v37 = vpack.i.bf16 %v1067_v40, %v1019_v22  ;;  %v1629_v41 = vpop.f32.mrb[37].mxu1 }
 0x539   :  { %v1070_v36 = vpop.f32.mrb[38].mxu1 }
 0x53a   :  { %v1630_v43 = vpop.f32.mrb[39].mxu1  ;;  %1715 = vrot.lane.b32.xlu0 %v1714_v37, %s1862_s8 }
 0x56f   :  { %v1706_v47 = vpop.permute.xlu0 %1705 }
 0x570   :  { %v1708_v23 = vunpack.i.h.bf16 %v1706_v47  ;;  %v1707_v28 = vunpack.i.l.bf16 %v1706_v47 }
 0x572   :  { %v1098_v51 = vsel %vm202_vm1, %v2159_v3, %v1708_v23  ;;  %v1097_v52 = vsel %vm202_vm1, %v2157_v62, %v1707_v28  ;;  %v1737_v62 = vld [vmem:[%s2258_s6] sm:$0xff]  }
 0x573   :  { %v1741_v3 = vld [vmem:[%s2258_s6 + $0x20] sm:$0xff]  }
 0x5a4   :  { %v1711_v48 = vpop.permute.xlu1 %1710 }
 0x5a5   :  { %v1713_v49 = vunpack.i.h.bf16 %v1711_v48  ;;  %v1712_v21 = vunpack.i.l.bf16 %v1711_v48 }
 0x5a7   :  { %v1101_v55 = vsel %vm1099_vm3, %v1098_v51, %v1713_v49  ;;  %v1100_v56 = vsel %vm1099_vm3, %v1097_v52, %v1712_v21 }
 0x5ac   :  { %v1716_v50 = vpop.permute.xlu0 %1715 }
 0x5ad   :  { %v1718_v53 = vunpack.i.h.bf16 %v1716_v50  ;;  %v1717_v54 = vunpack.i.l.bf16 %v1716_v50 }
 0x5af   :  { %v1104_v57 = vsel %vm1102_vm4, %v1101_v55, %v1718_v53  ;;  %v1103_v58 = vsel %vm1102_vm4, %v1100_v56, %v1717_v54 }
 0x5b0   :  { %v1105_v59 = vpack.c.bf16 %v1104_v57, %v1103_v58 }
 0x5b2   :  { %1636 = vmatmul.mubr.msk.bf16.vlgmr.msra.gmra.mrb[28].mxu0 %vm1129_vm5, %v1105_v59 }
 0x5b3   :  { %1675 = vmatprep.mubr.msk.bf16.mxu0 %vm1856_vm0, %v1855_v0  ;;  %1660 = vmatpush3.bf16.msra.mxu0 %v1737_v62 }
 0x5b4   :  { %1661 = vmatprep.subr.bf16.mxu0 %v1855_v0 }
 0x5b7   :  { %1662 = vmatpush3.bf16.msra.mxu0 %v1738_v63 }
 0x5b8   :  { %1663 = vmatprep.subr.bf16.mxu0 %v1855_v0 }
 0x5bb   :  { %1664 = vmatpush3.bf16.msra.mxu0 %v1739_v1 }
 0x5bc   :  { %1665 = vmatprep.subr.bf16.mxu0 %v1855_v0 }
 0x5bf   :  { %1666 = vmatpush3.bf16.msra.mxu0 %v1740_v2 }
 0x5c0   :  { %1667 = vmatprep.subr.bf16.mxu0 %v1855_v0 }
 0x5c3   :  { %1668 = vmatpush3.bf16.msra.mxu0 %v1741_v3 }
 0x5c4   :  { %1669 = vmatprep.subr.bf16.mxu0 %v1855_v0 }
 0x5c7   :  { %1670 = vmatpush3.bf16.msra.mxu0 %v1742_v4 }
 0x5c8   :  { %1671 = vmatprep.subr.bf16.mxu0 %v1855_v0 }
 0x5cb   :  { %1672 = vmatpush3.bf16.msra.mxu0 %v1743_v5 }
 0x5cc   :  { %1673 = vmatprep.subr.bf16.mxu0 %v1855_v0  ;;  %v1744_v0 = vld [vmem:[%s2258_s6 + $0x38] sm:$0xff]  }
 0x5cf   :  { %1674 = vmatpush3.bf16.msra.mxu0 %v1744_v0 }
 0x685   :  { %v1167_v7 = vpop.f32.mrb[28].mxu0 }
 0x686   :  { %v1168_v8 = vadd.f32 %v1433_v6, %v1167_v7  ;;  %v1637_v11 = vpop.f32.mrb[29].mxu0 }
 0x687   :  { %v1170_v12 = vpop.f32.mrb[30].mxu0 }
 0x688   :  { %v1171_v13 = vadd.f32 %v1433_v6, %v1170_v12  ;;  %v1638_v14 = vpop.f32.mrb[31].mxu0  ;;  %v1174_v15 = vadd.f32 %v1168_v8, %v1969_v9 }
 0x68a   :  { %v1175_v32 = vadd.f32 %v1171_v13, %v1971_v10 }
 0x68c   :  { %v1176_v29 = vpack.c.bf16 %v1175_v32, %v1174_v15 }
 0x68e   :  { %1656 = vmatmul.mubr.bf16.vlgmr.msra.gmra.mrb[40].mxu1 %v1176_v29 }
 0x761   :  { %v1275_v16 = vpop.f32.mrb[40].mxu1 }
 0x762   :  { %v1657_v17 = vpop.f32.mrb[41].mxu1 }
 0x763   :  { %v1278_v18 = vpop.f32.mrb[42].mxu1 }
 0x764   :  { %v1282_v19 = vpack.c.bf16 %v1278_v18, %v1275_v16  ;;  %v1658_v20 = vpop.f32.mrb[43].mxu1 }
 0x766   :  { %1676 = vmatmul.mubr.bf16.vlgmr.msra.gmra.mrb[32].mxu0 %v1282_v19 }
 0x839   :  { %v1381_v22 = vpop.f32.mrb[32].mxu0 }
 0x83a   :  { %v1382_v24 = vadd.f32 %v1381_v22, %v1174_v15  ;;  %v1677_v9 = vpop.f32.mrb[33].mxu0 }
 0x83b   :  { %v1384_v25 = vpop.f32.mrb[34].mxu0 }
 0x83c   :  { %1388 = vst [vmem:[#allocation7] sm:$0xff] %v1382_v24  ;;  %v1385_v10 = vadd.f32 %v1384_v25, %v1175_v32  ;;  %v1678_v26 = vpop.f32.mrb[35].mxu0 }
 0x83e   :  { %1389 = vst [vmem:[#allocation7 + $0x8] sm:$0xff] %v1385_v10 }
 0x83f   :  { %1832 = shalt.err (!%p1829_p6)
}
 0x840   :  { %s1833_s16 = scalar_lea.hbm %s2259_s7, 256 }
 0x841   :  { %p1834_p7 = scmp.ne.s32.totalorder %s2259_s7, %s1833_s16  ;;  %p1837_p8 = scmp.lt.u32.totalorder %s1833_s16, %s2259_s7 }
 0x843   :  { %p1839_p9 = pnand %p1837_p8, %p1834_p7 }
 0x845   :  { %1842 = shalt.err (!%p1839_p9)
}
 0x846   :  { %1401 = dma.vmem_to_hbm [thread:$0]  %s1396_s13, 256, %s2259_s7, [#allocation4], %s1850_s11, %s1850_s11, %s1851_s12  }
 0x847   :  { %1847 = dma.done.wait [#allocation4], 256  }
 0x848   :  { %1848 = vsyncadd [#allocation4], 4294967040 }
 0x849   :  { %1405 = vsyncpa [#allocation3], 1 }
 0x84a   :  { %1406 = vsyncpa [#allocation6], 1 }
 0x84b   :  { %1407 = vsyncpa [#allocation4], 1 }

</bundles_post_ra>
